<compile_context>
chip_gen: v7x
topology: tpu7x:2x2x1
jax: 0.10.0
libtpu: 0.0.40
codegen_flags: <defaults>
</compile_context>

<pallas_src>
import jax
import jax.numpy as jnp
from jax import lax
from jax.experimental import pallas as pl
from jax.experimental.pallas import tpu as pltpu


_LANE = 128
MAX_ROW_TILE = 4096   # ~11.5 MiB peak VMEM at this tile (32-wide minor dim lane-pads to 128);
                      # fits the 32 MiB scoped default on all of v5e/v6e/v7x with headroom.
SMALL_N = 1024        # below this: single bucketed block (grid overhead irrelevant).


def _round_up(x, m):
    return ((x + m - 1) // m) * m


# --------------------------------------------------------------------------
# Pallas kernel: fused 3-layer MLP, output stored lane-dense (D_out, rows)
# --------------------------------------------------------------------------
def _mlp3_kernel(x_ref, w1_ref, b1_ref, w2_ref, b2_ref, w3t_ref, b3_ref, o_ref):
    # In-kernel bf16 cast: activations stream from HBM in their native dtype; the
    # cast is a cheap VPU op hidden under the DMA / MXU.
    x = x_ref[...].astype(jnp.bfloat16)                                 # (tm, D_in)

    h1 = jnp.dot(x, w1_ref[...], preferred_element_type=jnp.float32)   # MXU, f32 acc
    h1 = jnp.maximum(h1 + b1_ref[...], 0.0)                            # f32 epilogue

    h2 = jnp.dot(h1.astype(jnp.bfloat16), w2_ref[...],
                 preferred_element_type=jnp.float32)
    h2 = jnp.maximum(h2 + b2_ref[...], 0.0)

    # Final layer computed directly in transposed form so the store is lane-dense:
    #   out_t[D_out, tm] = W3^T . H2^T  == contract-last-dims matmul (like q @ k^T).
    out_t = lax.dot_general(
        w3t_ref[...], h2.astype(jnp.bfloat16),
        dimension_numbers=(((1,), (1,)), ((), ())),
        preferred_element_type=jnp.float32)                            # (D_out, tm) f32
    o_ref[...] = (out_t + b3_ref[...]).astype(o_ref.dtype)             # identity out act


def _mlp3_pallas(x2d, w1, b1, w2, b2, w3t, b3c, row_tile):
    """x2d: (N, D_in) float, returns (D_out, N) f32.  N need not divide row_tile."""
    n, d_in = x2d.shape
    h1_dim = w1.shape[1]
    h2_dim = w2.shape[1]
    d_out = w3t.shape[0]
    grid = (pl.cdiv(n, row_tile),)

    full = lambda i: (0, 0)  # weights/biases: constant index_map -> resident in VMEM

    param_bytes = sum(int(a.size) * a.dtype.itemsize
                      for a in (w1, b1, w2, b2, w3t, b3c))
    cost = pl.CostEstimate(
        flops=2 * n * (d_in * h1_dim + h1_dim * h2_dim + h2_dim * d_out),
        transcendentals=0,
        bytes_accessed=n * d_in * x2d.dtype.itemsize + n * d_out * 4 + param_bytes,
    )

    return pl.pallas_call(
        _mlp3_kernel,
        out_shape=jax.ShapeDtypeStruct((d_out, n), jnp.float32),
        grid_spec=pltpu.PrefetchScalarGridSpec(
            num_scalar_prefetch=0,
            grid=grid,
            in_specs=[
                pl.BlockSpec((row_tile, d_in), lambda i: (i, 0)),   # activations (streamed)
                pl.BlockSpec((d_in, h1_dim), full),                 # W1 (resident)
                pl.BlockSpec((1, h1_dim), full),                    # b1
                pl.BlockSpec((h1_dim, h2_dim), full),               # W2
                pl.BlockSpec((1, h2_dim), full),                    # b2
                pl.BlockSpec((d_out, h2_dim), full),                # W3^T
                pl.BlockSpec((d_out, 1), full),                     # b3 (column)
            ],
            out_specs=pl.BlockSpec((d_out, row_tile), lambda i: (0, i)),
        ),
        compiler_params=pltpu.CompilerParams(
            dimension_semantics=("parallel",)),
        cost_estimate=cost,
    )(x2d, w1, b1, w2, b2, w3t, b3c)


# --------------------------------------------------------------------------
# Fully-jitted forward: reshape / (tiny) pad / pallas / slice / transpose fused
# --------------------------------------------------------------------------
@jax.jit
def _forward(hidden_states, w1, b1, w2, b2, w3t, b3c):
    lead = hidden_states.shape[:-1]
    d_in = hidden_states.shape[-1]
    d_out = w3t.shape[0]
    x2d = hidden_states.reshape(-1, d_in)        # native dtype; bf16 cast happens in-kernel
    n = x2d.shape[0]

    if n <= SMALL_N:
        # Single block, bucketed to a multiple of 128 rows.  The in-jit zero pad of at
        # most 1024x32 elems is negligible and keeps the set of kernel shapes small.
        row_tile = _round_up(max(n, 1), _LANE)
        if row_tile > n:
            x2d = jnp.pad(x2d, ((0, row_tile - n), (0, 0)))
    else:
        # >=2 grid steps so the "parallel" axis shards across both v7x TensorCores.
        # Ragged boundary block: OOB input rows read garbage, OOB output lanes are
        # masked on store, and the [:, :n] slice discards them (per-row dataflow).
        row_tile = min(MAX_ROW_TILE, _round_up(pl.cdiv(n, 2), _LANE))
        # If the xprof trace shows exposed input DMA at this tile, add
        # pipeline_mode=pl.Buffered(3) on the activation BlockSpec (cheap: +1 buffer).

    out_t = _mlp3_pallas(x2d, w1, b1, w2, b2, w3t, b3c, row_tile)   # (D_out, n_proc) f32
    out = out_t[:, :n].T                                            # tiny slab, fused in-jit
    return out.reshape(lead + (d_out,))


# --------------------------------------------------------------------------
# State_Reconstructor wrapper (param init matching PyTorch nn.Linear defaults)
# --------------------------------------------------------------------------
class StateReconstructorPallas:
    """recon_type='recon_s': FlattenMlp(input_size -> hidden_dims -> state_dim),
    hidden activation relu, output activation identity."""

    def __init__(self, key, input_size, hidden_dims, state_dim):
        dims = (input_size,) + tuple(hidden_dims) + (state_dim,)
        ws, bs = [], []
        for i in range(len(dims) - 1):
            key, kw, kb = jax.random.split(key, 3)
            bound = 1.0 / float(dims[i]) ** 0.5  # PyTorch nn.Linear default init range
            ws.append(jax.random.uniform(kw, (dims[i], dims[i + 1]),
                                         minval=-bound, maxval=bound,
                                         dtype=jnp.float32))
            bs.append(jax.random.uniform(kb, (1, dims[i + 1]),
                                         minval=-bound, maxval=bound,
                                         dtype=jnp.float32))
        assert len(ws) == 3, "kernel is specialized to 2 hidden layers"
        self.weights_f32 = ws          # (in, out) layout, f32 (reference)
        self.biases = bs               # (1, H) f32 (added post-accumulation in kernel)
        # Kernel-form params: bf16 matmul operands, last layer pre-transposed,
        # last bias as a (D_out, 1) column for lane-broadcast.
        self._kw1 = ws[0].astype(jnp.bfloat16)
        self._kw2 = ws[1].astype(jnp.bfloat16)
        self._kw3t = ws[2].T.astype(jnp.bfloat16)
        self._kb3c = bs[2].T            # (D_out, 1) f32
        self.output_size = state_dim

    def __call__(self, hidden_states):
        return _forward(hidden_states, self._kw1, self.biases[0],
                        self._kw2, self.biases[1], self._kw3t, self._kb3c)


# --------------------------------------------------------------------------
# Pure-JAX references for correctness checks
# --------------------------------------------------------------------------
def _reference_f32(hidden_states, weights_f32, biases):
    x = hidden_states.reshape(-1, hidden_states.shape[-1]).astype(jnp.float32)
    w1, w2, w3 = weights_f32
    b1, b2, b3 = biases
    h = jnp.maximum(x @ w1 + b1[0], 0.0)
    h = jnp.maximum(h @ w2 + b2[0], 0.0)
    out = h @ w3 + b3[0]
    return out.reshape(hidden_states.shape[:-1] + (w3.shape[1],))


def _reference_bf16(hidden_states, weights_f32, biases):
    # Mimics the kernel's bf16 operand rounding with f32 accumulation.
    rd = lambda a: a.astype(jnp.bfloat16).astype(jnp.float32)
    x = rd(hidden_states.reshape(-1, hidden_states.shape[-1]))
    w1, w2, w3 = (rd(w) for w in weights_f32)
    b1, b2, b3 = biases
    h = jnp.maximum(x @ w1 + b1[0], 0.0)
    h = jnp.maximum(rd(h) @ w2 + b2[0], 0.0)
    out = rd(h) @ w3 + b3[0]
    return out.reshape(hidden_states.shape[:-1] + (w3.shape[1],))


if __name__ == "__main__":
    key = jax.random.PRNGKey(0)
    k_param, k_x1, k_x2 = jax.random.split(key, 3)

    input_size, hidden_dims, state_dim = 32, (32, 32), 4
    model = StateReconstructorPallas(k_param, input_size, hidden_dims, state_dim)

    # Small demo consistent with the module: history reps (seq=8, batch=2, 32)
    # -> N=16, single bucketed block (row_tile=128).
    hs = jax.random.normal(k_x1, (8, 2, input_size), dtype=jnp.float32)
    out = jax.block_until_ready(model(hs))
    assert out.shape == (8, 2, state_dim), out.shape
    assert jnp.allclose(out, _reference_bf16(hs, model.weights_f32, model.biases),
                        atol=2e-3, rtol=2e-3), "mismatch vs bf16 reference"
    assert jnp.allclose(out, _reference_f32(hs, model.weights_f32, model.biases),
                        atol=5e-2, rtol=5e-2), "mismatch vs f32 reference"

    # Larger, non-tile-aligned batch exercises the ragged 2-step pipelined path
    # (N=1600 -> row_tile=896, grid=2, masked boundary block).
    hs2 = jax.random.normal(k_x2, (50, 32, input_size), dtype=jnp.float32)
    out2 = jax.block_until_ready(model(hs2))
    assert out2.shape == (50, 32, state_dim), out2.shape
    assert jnp.allclose(out2, _reference_bf16(hs2, model.weights_f32, model.biases),
                        atol=2e-3, rtol=2e-3), "mismatch vs bf16 reference (ragged path)"

    print("KERNEL_OK")
</pallas_src>

<mosaic_0001>
module attributes {stable_mosaic.version = 11 : i64} {
  func.func @_mlp3_kernel(%arg0: i32, %arg1: memref<128x32xf32, #tpu.memory_space<vmem>>, %arg2: memref<32x32xbf16, #tpu.memory_space<vmem>>, %arg3: memref<1x32xf32, #tpu.memory_space<vmem>>, %arg4: memref<32x32xbf16, #tpu.memory_space<vmem>>, %arg5: memref<1x32xf32, #tpu.memory_space<vmem>>, %arg6: memref<4x32xbf16, #tpu.memory_space<vmem>>, %arg7: memref<4x1xf32, #tpu.memory_space<vmem>>, %arg8: memref<4x128xf32, #tpu.memory_space<vmem>>) attributes {dimension_semantics = [#tpu.dimension_semantics<parallel>], iteration_bounds = array<i64: 1>, scalar_prefetch = 0 : i64, scratch_operands = 0 : i64, tpu.core_type = #tpu.core_type<tc>, window_params = [{transform_indices = @transform_0, window_bounds = array<i64: 128, 32>}, {pipeline_mode = #tpu.pipeline_mode<synchronous>, transform_indices = @transform_1, window_bounds = array<i64: 32, 32>}, {pipeline_mode = #tpu.pipeline_mode<synchronous>, transform_indices = @transform_2, window_bounds = array<i64: 1, 32>}, {pipeline_mode = #tpu.pipeline_mode<synchronous>, transform_indices = @transform_3, window_bounds = array<i64: 32, 32>}, {pipeline_mode = #tpu.pipeline_mode<synchronous>, transform_indices = @transform_4, window_bounds = array<i64: 1, 32>}, {pipeline_mode = #tpu.pipeline_mode<synchronous>, transform_indices = @transform_5, window_bounds = array<i64: 4, 32>}, {pipeline_mode = #tpu.pipeline_mode<synchronous>, transform_indices = @transform_6, window_bounds = array<i64: 4, 1>}, {transform_indices = @transform_7, window_bounds = array<i64: 4, 128>}]} {
    %c0 = arith.constant 0 : index
    %c0_0 = arith.constant 0 : index
    %0 = vector.load %arg1[%c0, %c0_0] : memref<128x32xf32, #tpu.memory_space<vmem>>, vector<128x32xf32>
    %1 = arith.truncf %0 : vector<128x32xf32> to vector<128x32xbf16>
    %c0_1 = arith.constant 0 : index
    %c0_2 = arith.constant 0 : index
    %2 = vector.load %arg2[%c0_1, %c0_2] : memref<32x32xbf16, #tpu.memory_space<vmem>>, vector<32x32xbf16>
    %cst = arith.constant dense<0.000000e+00> : vector<128x32xf32>
    %3 = tpu.matmul %1, %2, %cst {dimension_numbers = #tpu.dot_dimension_numbers<[1], [0], [0], [1], [0, 0, 1, 1], [], []>} : vector<128x32xbf16>, vector<32x32xbf16>, vector<128x32xf32> -> vector<128x32xf32>
    %c0_3 = arith.constant 0 : index
    %c0_4 = arith.constant 0 : index
    %4 = vector.load %arg3[%c0_3, %c0_4] : memref<1x32xf32, #tpu.memory_space<vmem>>, vector<1x32xf32>
    %5 = vector.broadcast %4 : vector<1x32xf32> to vector<128x32xf32>
    %6 = arith.addf %3, %5 : vector<128x32xf32>
    %cst_5 = arith.constant 0.000000e+00 : f32
    %7 = vector.broadcast %cst_5 : f32 to vector<128x32xf32>
    %8 = arith.maximumf %6, %7 : vector<128x32xf32>
    %9 = arith.truncf %8 : vector<128x32xf32> to vector<128x32xbf16>
    %c0_6 = arith.constant 0 : index
    %c0_7 = arith.constant 0 : index
    %10 = vector.load %arg4[%c0_6, %c0_7] : memref<32x32xbf16, #tpu.memory_space<vmem>>, vector<32x32xbf16>
    %cst_8 = arith.constant dense<0.000000e+00> : vector<128x32xf32>
    %11 = tpu.matmul %9, %10, %cst_8 {dimension_numbers = #tpu.dot_dimension_numbers<[1], [0], [0], [1], [0, 0, 1, 1], [], []>} : vector<128x32xbf16>, vector<32x32xbf16>, vector<128x32xf32> -> vector<128x32xf32>
    %c0_9 = arith.constant 0 : index
    %c0_10 = arith.constant 0 : index
    %12 = vector.load %arg5[%c0_9, %c0_10] : memref<1x32xf32, #tpu.memory_space<vmem>>, vector<1x32xf32>
    %13 = vector.broadcast %12 : vector<1x32xf32> to vector<128x32xf32>
    %14 = arith.addf %11, %13 : vector<128x32xf32>
    %cst_11 = arith.constant 0.000000e+00 : f32
    %15 = vector.broadcast %cst_11 : f32 to vector<128x32xf32>
    %16 = arith.maximumf %14, %15 : vector<128x32xf32>
    %c0_12 = arith.constant 0 : index
    %c0_13 = arith.constant 0 : index
    %17 = vector.load %arg6[%c0_12, %c0_13] : memref<4x32xbf16, #tpu.memory_space<vmem>>, vector<4x32xbf16>
    %18 = arith.truncf %16 : vector<128x32xf32> to vector<128x32xbf16>
    %cst_14 = arith.constant dense<0.000000e+00> : vector<4x128xf32>
    %19 = tpu.matmul %17, %18, %cst_14 {dimension_numbers = #tpu.dot_dimension_numbers<[1], [1], [0], [0], [0, 0, 1, 0], [], []>} : vector<4x32xbf16>, vector<128x32xbf16>, vector<4x128xf32> -> vector<4x128xf32>
    %c0_15 = arith.constant 0 : index
    %c0_16 = arith.constant 0 : index
    %20 = vector.load %arg7[%c0_15, %c0_16] : memref<4x1xf32, #tpu.memory_space<vmem>>, vector<4x1xf32>
    %21 = vector.broadcast %20 : vector<4x1xf32> to vector<4x128xf32>
    %22 = arith.addf %19, %21 : vector<4x128xf32>
    %c0_17 = arith.constant 0 : index
    %c0_18 = arith.constant 0 : index
    %23 = vector.load %arg8[%c0_17, %c0_18] : memref<4x128xf32, #tpu.memory_space<vmem>>, vector<4x128xf32>
    tpu.vector_store %arg8[%c0_17, %c0_18], %22 {strides = array<i32>} : memref<4x128xf32, #tpu.memory_space<vmem>>, vector<4x128xf32>,
    return
  }
  func.func @transform_0(%arg0: i32) -> (i32, i32) {
    %c0_i32 = arith.constant 0 : i32
    %c0_i32_0 = arith.constant 0 : i32
    return %arg0, %c0_i32 : i32, i32
  }
  func.func @transform_1(%arg0: i32) -> (i32, i32) {
    %c0_i32 = arith.constant 0 : i32
    %c0_i32_0 = arith.constant 0 : i32
    %c0_i32_1 = arith.constant 0 : i32
    return %c0_i32, %c0_i32_0 : i32, i32
  }
  func.func @transform_2(%arg0: i32) -> (i32, i32) {
    %c0_i32 = arith.constant 0 : i32
    %c0_i32_0 = arith.constant 0 : i32
    %c0_i32_1 = arith.constant 0 : i32
    return %c0_i32, %c0_i32_0 : i32, i32
  }
  func.func @transform_3(%arg0: i32) -> (i32, i32) {
    %c0_i32 = arith.constant 0 : i32
    %c0_i32_0 = arith.constant 0 : i32
    %c0_i32_1 = arith.constant 0 : i32
    return %c0_i32, %c0_i32_0 : i32, i32
  }
  func.func @transform_4(%arg0: i32) -> (i32, i32) {
    %c0_i32 = arith.constant 0 : i32
    %c0_i32_0 = arith.constant 0 : i32
    %c0_i32_1 = arith.constant 0 : i32
    return %c0_i32, %c0_i32_0 : i32, i32
  }
  func.func @transform_5(%arg0: i32) -> (i32, i32) {
    %c0_i32 = arith.constant 0 : i32
    %c0_i32_0 = arith.constant 0 : i32
    %c0_i32_1 = arith.constant 0 : i32
    return %c0_i32, %c0_i32_0 : i32, i32
  }
  func.func @transform_6(%arg0: i32) -> (i32, i32) {
    %c0_i32 = arith.constant 0 : i32
    %c0_i32_0 = arith.constant 0 : i32
    %c0_i32_1 = arith.constant 0 : i32
    return %c0_i32, %c0_i32_0 : i32, i32
  }
  func.func @transform_7(%arg0: i32) -> (i32, i32) {
    %c0_i32 = arith.constant 0 : i32
    %c0_i32_0 = arith.constant 0 : i32
    return %c0_i32, %arg0 : i32, i32
  }
}

</mosaic_0001>

<bundles_post_ra>
// kernel: _forward.1
= control target key start
LH: loop header
LB: loop body
LE: loop exit
PB: predicated region body
PF: predicated region fallthrough
CT: control target
= control target key end

     0   :  { %vm74_vm0 = vcmask 261120   ;;  %vm588_vm1 = vmmov 0   ;;  %s739_s1 = inlined_call_operand.vmem [shape: bf16[32,32], index: 1, kind: input, shape index: {}]   ;;  %s740_s0 = inlined_call_operand.vmem [shape: f32[128,32], index: 0, kind: input, shape index: {}]   ;;  %s741_s3 = inlined_call_operand.vmem [shape: bf16[32,32], index: 3, kind: input, shape index: {}]   ;;  %s742_s2 = inlined_call_operand.vmem [shape: f32[1,32], index: 2, kind: input, shape index: {}]   ;;  %s743_s6 = inlined_call_operand.vmem [shape: f32[4,1], index: 6, kind: input, shape index: {}]   ;;  %s744_s4 = inlined_call_operand.vmem [shape: f32[1,32], index: 4, kind: input, shape index: {}]   ;;  %s745_s5 = inlined_call_operand.vmem [shape: bf16[4,32], index: 5, kind: input, shape index: {}]   ;;  %s746_s7 = inlined_call_operand.vmem [shape: f32[4,128], index: 7, kind: output, shape index: {}]  }
   0x1   :  { %v583_v0 = vld [vmem:[%s739_s1] sm:$0xff]   ;;  %v584_v1 = vld [vmem:[%s739_s1 + $0x8] sm:$0xff]   ;;  %v29_v5 = vld [vmem:[%s740_s0 + $0x10] sm:$0xff] }
   0x2   :  { %519 = vmatprep.subr.bf16.mxu1 %v583_v0  ;;  %v27_v2 = vld [vmem:[%s740_s0] sm:$0xff]  ;;  %v28_v3 = vld [vmem:[%s740_s0 + $0x8] sm:$0xff]  ;;  %v30_v6 = vld [vmem:[%s740_s0 + $0x18] sm:$0xff] }
   0x3   :  { %520 = vmatpush3.bf16.msra.mxu1 %v583_v0  ;;  %v43_v4 = vpack.c.bf16 %v28_v3, %v27_v2  ;;  %v31_v7 = vld [vmem:[%s740_s0 + $0x20] sm:$0xff]  ;;  %v32_v8 = vld [vmem:[%s740_s0 + $0x28] sm:$0xff]  ;;  %v44_v9 = vpack.c.bf16 %v30_v6, %v29_v5  ;;  %v33_v13 = vld [vmem:[%s740_s0 + $0x30] sm:$0xff] }
   0x4   :  { %521 = vmatprep.subr.bf16.mxu1 %v584_v1  ;;  %v45_v10 = vpack.c.bf16 %v32_v8, %v31_v7  ;;  %v585_v11 = vld [vmem:[%s741_s3] sm:$0xff]   ;;  %v586_v12 = vld [vmem:[%s741_s3 + $0x8] sm:$0xff]   ;;  %v34_v14 = vld [vmem:[%s740_s0 + $0x38] sm:$0xff] }
   0x5   :  { %523 = vmatprep.mubr.msk.bf16.mxu1 %vm74_vm0, %v43_v4  ;;  %v35_v15 = vld [vmem:[%s740_s0 + $0x40] sm:$0xff]  ;;  %v36_v16 = vld [vmem:[%s740_s0 + $0x48] sm:$0xff]  ;;  %v46_v17 = vpack.c.bf16 %v34_v14, %v33_v13  ;;  %v37_v19 = vld [vmem:[%s740_s0 + $0x50] sm:$0xff] }
   0x6   :  { %v47_v18 = vpack.c.bf16 %v36_v16, %v35_v15  ;;  %v38_v20 = vld [vmem:[%s740_s0 + $0x58] sm:$0xff]  ;;  %v39_v21 = vld [vmem:[%s740_s0 + $0x60] sm:$0xff]  ;;  %v40_v22 = vld [vmem:[%s740_s0 + $0x68] sm:$0xff] }
   0x7   :  { %522 = vmatpush3.bf16.msra.mxu1 %v584_v1  ;;  %v48_v23 = vpack.c.bf16 %v38_v20, %v37_v19  ;;  %v49_v24 = vpack.c.bf16 %v40_v22, %v39_v21  ;;  %v41_v25 = vld [vmem:[%s740_s0 + $0x70] sm:$0xff]  ;;  %v42_v26 = vld [vmem:[%s740_s0 + $0x78] sm:$0xff]  ;;  %v467_v28 = vld [vmem:[%s742_s2] ss:$0 sm:$0xff]  ;;  %v587_v21 = vmov 0.0   ;;  %v589_v22 = vmov 0  }
   0x8   :  { %539 = vmatprep.subr.bf16.mxu1 %v585_v11  ;;  %v50_v27 = vpack.c.bf16 %v42_v26, %v41_v25  ;;  %559 = vmatprep.subr.bf16.mxu0 %v587_v21 }
   0x9   :  { %575 = vmatprep.mubr.msk.bf16.mxu0 %vm588_vm1, %v587_v21  ;;  %582 = vset.pattern.permute.xlu0 %v589_v22 }
   0xa   :  { %524 = vmatmul.mubr.msk.bf16.vlgmr.msra.gmra.mrb[0].mxu1 %vm74_vm0, %v44_v9 }
   0xb   :  { %527 = vmatprep.mubr.msk.bf16.mxu1 %vm74_vm0, %v45_v10  ;;  %540 = vmatpush3.bf16.msra.mxu1 %v585_v11 }
   0xc   :  { %541 = vmatprep.subr.bf16.mxu1 %v586_v12 }
   0xf   :  { %542 = vmatpush3.bf16.msra.mxu1 %v586_v12 }
  0x12   :  { %528 = vmatmul.mubr.msk.bf16.gmra.mrb[4].mxu1 %vm74_vm0, %v46_v17 }
  0x13   :  { %531 = vmatprep.mubr.msk.bf16.mxu1 %vm74_vm0, %v47_v18 }
  0x1a   :  { %532 = vmatmul.mubr.msk.bf16.gmra.mrb[8].mxu1 %vm74_vm0, %v48_v23  ;;  %v389_v23 = vld [vmem:[%s743_s6] sm:$0xf] }
  0x1b   :  { %535 = vmatprep.mubr.msk.bf16.mxu1 %vm74_vm0, %v49_v24  ;;  %392 = vperm.xlu0 %582, %v389_v23   ;;  %v478_v24 = vld [vmem:[%s744_s4] ss:$0 sm:$0xff] }
  0x22   :  { %536 = vmatmul.mubr.msk.bf16.gmra.mrb[12].mxu1 %vm74_vm0, %v50_v27 }
  0xdd   :  { %v525_v29 = vpop.f32.mrb[0].mxu1 }
  0xde   :  { %v142_v30 = vadd.f32 %v525_v29, %v467_v28  ;;  %v133_v31 = vpop.f32.mrb[1].mxu1 }
  0xdf   :  { %v134_v32 = vadd.f32 %v467_v28, %v133_v31  ;;  %v526_v33 = vpop.f32.mrb[2].mxu1 }
  0xe0   :  { %v145_v34 = vadd.f32 %v526_v33, %v467_v28  ;;  %v136_v35 = vpop.f32.mrb[3].mxu1  ;;  %v198_v37 = vmax.f32 %v142_v30, 0.0 }
  0xe1   :  { %v137_v36 = vadd.f32 %v467_v28, %v136_v35  ;;  %v196_v39 = vmax.f32 %v134_v32, 0.0 }
  0xe2   :  { %v199_v38 = vmax.f32 %v145_v34, 0.0 }
  0xe3   :  { %v197_v40 = vmax.f32 %v137_v36, 0.0 }
  0xe4   :  { %v213_v41 = vpack.c.bf16 %v199_v38, %v198_v37 }
  0xe5   :  { %v212_v42 = vpack.c.bf16 %v197_v40, %v196_v39  ;;  %v529_v43 = vpop.f32.mrb[4].mxu1 }
  0xe6   :  { %v158_v44 = vadd.f32 %v529_v43, %v467_v28  ;;  %v149_v45 = vpop.f32.mrb[5].mxu1 }
  0xe7   :  { %v150_v46 = vadd.f32 %v467_v28, %v149_v45  ;;  %543 = vmatprep.mubr.msk.bf16.mxu1 %vm74_vm0, %v212_v42  ;;  %v530_v47 = vpop.f32.mrb[6].mxu1 }
  0xe8   :  { %v202_v48 = vmax.f32 %v158_v44, 0.0  ;;  %v161_v49 = vadd.f32 %v530_v47, %v467_v28  ;;  %544 = vmatmul.mubr.msk.bf16.vlgmr.msra.gmra.mrb[16].mxu1 %vm74_vm0, %v213_v41  ;;  %v152_v50 = vpop.f32.mrb[7].mxu1 }
  0xe9   :  { %v200_v51 = vmax.f32 %v150_v46, 0.0  ;;  %v153_v52 = vadd.f32 %v467_v28, %v152_v50 }
  0xea   :  { %v203_v53 = vmax.f32 %v161_v49, 0.0 }
  0xeb   :  { %v201_v54 = vmax.f32 %v153_v52, 0.0 }
  0xec   :  { %v215_v55 = vpack.c.bf16 %v203_v53, %v202_v48 }
  0xed   :  { %v214_v56 = vpack.c.bf16 %v201_v54, %v200_v51  ;;  %v533_v57 = vpop.f32.mrb[8].mxu1 }
  0xee   :  { %v174_v58 = vadd.f32 %v533_v57, %v467_v28  ;;  %v165_v59 = vpop.f32.mrb[9].mxu1 }
  0xef   :  { %547 = vmatprep.mubr.msk.bf16.mxu1 %vm74_vm0, %v214_v56  ;;  %v166_v60 = vadd.f32 %v467_v28, %v165_v59  ;;  %v534_v61 = vpop.f32.mrb[10].mxu1 }
  0xf0   :  { %548 = vmatmul.mubr.msk.bf16.gmra.mrb[20].mxu1 %vm74_vm0, %v215_v55  ;;  %v206_v62 = vmax.f32 %v174_v58, 0.0  ;;  %v177_v63 = vadd.f32 %v534_v61, %v467_v28  ;;  %v168_v0 = vpop.f32.mrb[11].mxu1 }
  0xf1   :  { %v204_v1 = vmax.f32 %v166_v60, 0.0  ;;  %v169_v2 = vadd.f32 %v467_v28, %v168_v0 }
  0xf2   :  { %v207_v3 = vmax.f32 %v177_v63, 0.0 }
  0xf3   :  { %v205_v4 = vmax.f32 %v169_v2, 0.0 }
  0xf4   :  { %v217_v5 = vpack.c.bf16 %v207_v3, %v206_v62 }
  0xf5   :  { %v216_v6 = vpack.c.bf16 %v205_v4, %v204_v1  ;;  %v537_v7 = vpop.f32.mrb[12].mxu1 }
  0xf6   :  { %v190_v8 = vadd.f32 %v537_v7, %v467_v28  ;;  %v181_v9 = vpop.f32.mrb[13].mxu1 }
  0xf7   :  { %551 = vmatprep.mubr.msk.bf16.mxu1 %vm74_vm0, %v216_v6  ;;  %v182_v10 = vadd.f32 %v467_v28, %v181_v9  ;;  %v538_v11 = vpop.f32.mrb[14].mxu1 }
  0xf8   :  { %552 = vmatmul.mubr.msk.bf16.gmra.mrb[24].mxu1 %vm74_vm0, %v217_v5  ;;  %v210_v12 = vmax.f32 %v190_v8, 0.0  ;;  %v193_v13 = vadd.f32 %v538_v11, %v467_v28  ;;  %v184_v14 = vpop.f32.mrb[15].mxu1 }
  0xf9   :  { %v208_v15 = vmax.f32 %v182_v10, 0.0  ;;  %v185_v16 = vadd.f32 %v467_v28, %v184_v14 }
  0xfa   :  { %v211_v17 = vmax.f32 %v193_v13, 0.0 }
  0xfb   :  { %v209_v18 = vmax.f32 %v185_v16, 0.0 }
  0xfc   :  { %v219_v19 = vpack.c.bf16 %v211_v17, %v210_v12 }
  0xfd   :  { %v218_v20 = vpack.c.bf16 %v209_v18, %v208_v15 }
  0xff   :  { %555 = vmatprep.mubr.msk.bf16.mxu1 %vm74_vm0, %v218_v20 }
 0x100   :  { %556 = vmatmul.mubr.msk.bf16.gmra.mrb[28].mxu1 %vm74_vm0, %v219_v19 }
 0x1bb   :  { %v545_v25 = vpop.f32.mrb[16].mxu1 }
 0x1bc   :  { %v310_v26 = vadd.f32 %v545_v25, %v478_v24  ;;  %v301_v27 = vpop.f32.mrb[17].mxu1 }
 0x1bd   :  { %v302_v28 = vadd.f32 %v478_v24, %v301_v27  ;;  %v546_v29 = vpop.f32.mrb[18].mxu1  ;;  %v393_v27 = vpop.permute.xlu0 %392 }
 0x1be   :  { %v313_v30 = vadd.f32 %v546_v29, %v478_v24  ;;  %v304_v31 = vpop.f32.mrb[19].mxu1  ;;  %v366_v33 = vmax.f32 %v310_v26, 0.0  ;;  %v380_v26 = vld [vmem:[%s745_s5] sm:$0x3] }
 0x1bf   :  { %v305_v32 = vadd.f32 %v478_v24, %v304_v31  ;;  %v364_v35 = vmax.f32 %v302_v28, 0.0 }
 0x1c0   :  { %v367_v34 = vmax.f32 %v313_v30, 0.0 }
 0x1c1   :  { %v365_v36 = vmax.f32 %v305_v32, 0.0 }
 0x1c2   :  { %v382_v37 = vpack.c.bf16 %v367_v34, %v366_v33 }
 0x1c3   :  { %v549_v38 = vpop.f32.mrb[20].mxu1  ;;  %v381_v39 = vpack.c.bf16 %v365_v36, %v364_v35 }
 0x1c4   :  { %v326_v40 = vadd.f32 %v549_v38, %v478_v24  ;;  %v317_v41 = vpop.f32.mrb[21].mxu1  ;;  %v402_v57 = vsel %vm74_vm0, %v382_v37, 0 }
 0x1c5   :  { %v318_v42 = vadd.f32 %v478_v24, %v317_v41  ;;  %v550_v43 = vpop.f32.mrb[22].mxu1  ;;  %v399_v44 = vsel %vm74_vm0, %v381_v39, 0 }
 0x1c6   :  { %v370_v45 = vmax.f32 %v326_v40, 0.0  ;;  %v329_v46 = vadd.f32 %v550_v43, %v478_v24  ;;  %560 = vmatpush3.bf16.xpose.msra.mxu0 %v399_v44  ;;  %v320_v47 = vpop.f32.mrb[23].mxu1 }
 0x1c7   :  { %v368_v48 = vmax.f32 %v318_v42, 0.0  ;;  %v321_v49 = vadd.f32 %v478_v24, %v320_v47  ;;  %561 = vmatprep.subr.bf16.mxu0 %v587_v21 }
 0x1c8   :  { %v371_v50 = vmax.f32 %v329_v46, 0.0 }
 0x1c9   :  { %v369_v51 = vmax.f32 %v321_v49, 0.0 }
 0x1ca   :  { %v384_v52 = vpack.c.bf16 %v371_v50, %v370_v45 }
 0x1cb   :  { %v383_v53 = vpack.c.bf16 %v369_v51, %v368_v48  ;;  %v553_v54 = vpop.f32.mrb[24].mxu1 }
 0x1cc   :  { %v342_v55 = vadd.f32 %v553_v54, %v478_v24  ;;  %v333_v56 = vpop.f32.mrb[25].mxu1  ;;  %v408_v20 = vsel %vm74_vm0, %v384_v52, 0 }
 0x1cd   :  { %v334_v58 = vadd.f32 %v478_v24, %v333_v56  ;;  %v554_v59 = vpop.f32.mrb[26].mxu1  ;;  %v405_v8 = vsel %vm74_vm0, %v383_v53, 0 }
 0x1ce   :  { %562 = vmatpush3.bf16.xpose.msra.mxu0 %v402_v57  ;;  %v374_v60 = vmax.f32 %v342_v55, 0.0  ;;  %v345_v61 = vadd.f32 %v554_v59, %v478_v24  ;;  %v336_v62 = vpop.f32.mrb[27].mxu1 }
 0x1cf   :  { %v372_v63 = vmax.f32 %v334_v58, 0.0  ;;  %563 = vmatprep.subr.bf16.mxu0 %v587_v21  ;;  %v337_v0 = vadd.f32 %v478_v24, %v336_v62 }
 0x1d0   :  { %v375_v1 = vmax.f32 %v345_v61, 0.0 }
 0x1d1   :  { %v373_v2 = vmax.f32 %v337_v0, 0.0 }
 0x1d2   :  { %v386_v3 = vpack.c.bf16 %v375_v1, %v374_v60 }
 0x1d3   :  { %v385_v4 = vpack.c.bf16 %v373_v2, %v372_v63  ;;  %v557_v5 = vpop.f32.mrb[28].mxu1 }
 0x1d4   :  { %v358_v6 = vadd.f32 %v557_v5, %v478_v24  ;;  %v349_v7 = vpop.f32.mrb[29].mxu1  ;;  %v414_v23 = vsel %vm74_vm0, %v386_v3, 0 }
 0x1d5   :  { %v350_v9 = vadd.f32 %v478_v24, %v349_v7  ;;  %v558_v10 = vpop.f32.mrb[30].mxu1  ;;  %v411_v22 = vsel %vm74_vm0, %v385_v4, 0 }
 0x1d6   :  { %564 = vmatpush3.bf16.xpose.msra.mxu0 %v405_v8  ;;  %v378_v11 = vmax.f32 %v358_v6, 0.0  ;;  %v361_v12 = vadd.f32 %v558_v10, %v478_v24  ;;  %v352_v13 = vpop.f32.mrb[31].mxu1 }
 0x1d7   :  { %565 = vmatprep.subr.bf16.mxu0 %v587_v21  ;;  %v376_v14 = vmax.f32 %v350_v9, 0.0  ;;  %v353_v15 = vadd.f32 %v478_v24, %v352_v13 }
 0x1d8   :  { %v379_v16 = vmax.f32 %v361_v12, 0.0 }
 0x1d9   :  { %v377_v17 = vmax.f32 %v353_v15, 0.0 }
 0x1da   :  { %v388_v18 = vpack.c.bf16 %v379_v16, %v378_v11 }
 0x1db   :  { %v387_v19 = vpack.c.bf16 %v377_v17, %v376_v14 }
 0x1dc   :  { %v420_v25 = vsel %vm74_vm0, %v388_v18, 0 }
 0x1dd   :  { %v417_v24 = vsel %vm74_vm0, %v387_v19, 0 }
 0x1de   :  { %566 = vmatpush3.bf16.xpose.msra.mxu0 %v408_v20 }
 0x1df   :  { %567 = vmatprep.subr.bf16.mxu0 %v587_v21 }
 0x1e6   :  { %568 = vmatpush3.bf16.xpose.msra.mxu0 %v411_v22 }
 0x1e7   :  { %569 = vmatprep.subr.bf16.mxu0 %v587_v21 }
 0x1ee   :  { %570 = vmatpush3.bf16.xpose.msra.mxu0 %v414_v23 }
 0x1ef   :  { %571 = vmatprep.subr.bf16.mxu0 %v587_v21 }
 0x1f6   :  { %572 = vmatpush3.bf16.xpose.msra.mxu0 %v417_v24 }
 0x1f7   :  { %573 = vmatprep.subr.bf16.mxu0 %v587_v21 }
 0x1fe   :  { %574 = vmatpush3.bf16.xpose.msra.mxu0 %v420_v25 }
 0x205   :  { %576 = vmatmul.mubr.msk.bf16.vlgmr.msra.gmra.mrb[0].mxu0 %vm74_vm0, %v380_v26 }
 0x2d8   :  { %v456_v28 = vpop.f32.mrb[0].mxu0 }
 0x2d9   :  { %v457_v29 = vadd.f32 %v456_v28, %v393_v27  ;;  %v577_v30 = vpop.f32.mrb[1].mxu0 }
 0x2da   :  { %v459_v31 = vpop.f32.mrb[2].mxu0 }
 0x2db   :  { %462 = vst [vmem:[%s746_s7] sm:$0xf] %v457_v29  ;;  %v578_v32 = vpop.f32.mrb[3].mxu0 }

</bundles_post_ra>
